<compile_context>
chip_gen: v7x
topology: tpu7x:2x2x1
jax: 0.10.0
libtpu: 0.0.40
codegen_flags: <defaults>
</compile_context>

<pallas_src>
import functools

import jax
import jax.numpy as jnp
from jax.experimental import pallas as pl
from jax.experimental.pallas import tpu as pltpu

RNNT_BLANK = 28                # MLPerf RNN-T blank id (29-way vocab)
MAX_SYMBOLS_PER_STEP = 30      # MLPerf RNN-T max symbols emitted per time step


def _update_kernel(
    # inputs
    tidx_smem,                                              # SMEM [B] int32
    sym_ref, sa_ref, ridx_ref, tidx_ref, flen_ref, preg_ref,  # VMEM [B,1] int32
    res_ref, fi_ref, prehg_ref, precg_ref, hg_ref, cg_ref,  # VMEM vector state
    f_hbm,                                                  # ANY (HBM) [B,T,H]
    # outputs
    sa_out, ridx_out, tidx_out, preg_out,
    res_out, fi_out, prehg_out, precg_out,
    # scratch
    framebuf, copy_sem,
    *, blank_id, max_symbols):
  B, _ = fi_ref.shape
  T = f_hbm.shape[1]

  # --- 1) kick off one tiny DMA per batch row: the candidate next frame ---
  # f[b, min(time_idx[b] + 1, T - 1)].  Rows that don't advance are masked out
  # in the blend below, so fetching a harmless frame for them is fine.
  @pl.loop(0, B)
  def _start(b):
    t = jnp.minimum(tidx_smem[b] + 1, T - 1)
    pltpu.make_async_copy(f_hbm.at[b, t], framebuf.at[b], copy_sem).start()

  # --- 2) vectorized per-batch scalar-state update (full-vreg VPU selects) ---
  sym, sa, ridx = sym_ref[...], sa_ref[...], ridx_ref[...]
  tidx, flen, preg = tidx_ref[...], flen_ref[...], preg_ref[...]

  active = tidx < flen
  emit = active & (sym != blank_id) & (sa < max_symbols)
  advance = active & jnp.logical_not(emit)
  new_tidx = jnp.where(advance, tidx + 1, tidx)

  sa_out[...] = jnp.where(emit, sa + 1, jnp.where(advance, 0, sa))
  ridx_out[...] = jnp.where(emit, ridx + 1, ridx)
  tidx_out[...] = new_tidx
  preg_out[...] = jnp.where(emit, sym, preg)

  # transcript: res[b, res_idx[b]] = symbol where emitting (masked lane write)
  pos = jax.lax.broadcasted_iota(jnp.int32, res_ref.shape, 1)
  res_out[...] = jnp.where(emit & (pos == ridx),
                           sym.astype(res_ref.dtype), res_ref[...])

  # prediction-net hidden/cell commit when a symbol was emitted (lane-dense [B, L*H])
  prehg_out[...] = jnp.where(emit, hg_ref[...], prehg_ref[...])
  precg_out[...] = jnp.where(emit, cg_ref[...], precg_ref[...])

  # --- 3) wait for the frame DMAs and blend into fi ---
  @pl.loop(0, B)
  def _wait(b):
    t = jnp.minimum(tidx_smem[b] + 1, T - 1)
    pltpu.make_async_copy(f_hbm.at[b, t], framebuf.at[b], copy_sem).wait()

  take = advance & (new_tidx < flen)
  fi_out[...] = jnp.where(take, framebuf[...].astype(fi_ref.dtype), fi_ref[...])


def greedy_decode_update(symbols, symbols_added, res, res_idx, f, f_lens,
                         time_idx, fi, pre_g, pre_hg, pre_cg, hg, cg,
                         *, blank_id=RNNT_BLANK,
                         max_symbols=MAX_SYMBOLS_PER_STEP):
  B, T, H = f.shape
  L = len(pre_hg)
  max_len = res.shape[-1]
  mp = ((max_len + 127) // 128) * 128      # pad transcript to lane-dense width
  i32 = jnp.int32

  col = lambda x: x.astype(i32).reshape(B, 1)

  # lane-dense state: stack layers along the lane (feature) axis -> [B, L*H]
  prehg_c = jnp.concatenate(pre_hg, axis=-1)
  precg_c = jnp.concatenate(pre_cg, axis=-1)
  hg_c = jnp.concatenate(hg, axis=-1)
  cg_c = jnp.concatenate(cg, axis=-1)
  res_p = jnp.pad(res, ((0, 0), (0, mp - max_len)))

  smem = pl.BlockSpec(memory_space=pltpu.MemorySpace.SMEM)
  vmem = pl.BlockSpec(memory_space=pltpu.MemorySpace.VMEM)
  hbm = pl.BlockSpec(memory_space=pl.ANY)

  kernel = functools.partial(_update_kernel, blank_id=blank_id,
                             max_symbols=max_symbols)

  outs = pl.pallas_call(
      kernel,
      in_specs=[smem] + [vmem] * 12 + [hbm],
      out_specs=[vmem] * 8,
      out_shape=[
          jax.ShapeDtypeStruct((B, 1), i32),             # symbols_added
          jax.ShapeDtypeStruct((B, 1), i32),             # res_idx
          jax.ShapeDtypeStruct((B, 1), i32),             # time_idx
          jax.ShapeDtypeStruct((B, 1), i32),             # pre_g
          jax.ShapeDtypeStruct((B, mp), res.dtype),      # res (padded)
          jax.ShapeDtypeStruct((B, H), fi.dtype),        # fi
          jax.ShapeDtypeStruct((B, L * H), prehg_c.dtype),  # pre_hg
          jax.ShapeDtypeStruct((B, L * H), precg_c.dtype),  # pre_cg
      ],
      scratch_shapes=[
          pltpu.VMEM((B, H), f.dtype),   # fetched candidate frames
          pltpu.SemaphoreType.DMA,       # shared DMA completion semaphore
      ],
      # reuse the state buffers across decode steps (no fresh HBM alloc/copy)
      input_output_aliases={2: 0, 3: 1, 4: 2, 6: 3, 7: 4, 8: 5, 9: 6, 10: 7},
  )(time_idx.astype(i32),
    col(symbols), col(symbols_added), col(res_idx), col(time_idx),
    col(f_lens), col(pre_g),
    res_p, fi, prehg_c, precg_c, hg_c, cg_c, f)

  sa_o, ridx_o, tidx_o, preg_o, res_o, fi_o, prehg_o, precg_o = outs
  tidx_new = tidx_o[:, 0]
  done = jnp.all(tidx_new >= f_lens.astype(i32))     # reduction in the wrapper
  return done, dict(
      symbols_added=sa_o[:, 0],
      res=res_o[:, :max_len],
      res_idx=ridx_o[:, 0],
      time_idx=tidx_new,
      fi=fi_o,
      pre_g=preg_o[:, 0],
      pre_hg=[prehg_o[:, l * H:(l + 1) * H] for l in range(L)],
      pre_cg=[precg_o[:, l * H:(l + 1) * H] for l in range(L)],
  )


def reference_update(symbols, symbols_added, res, res_idx, f, f_lens,
                     time_idx, fi, pre_g, pre_hg, pre_cg, hg, cg,
                     blank_id=RNNT_BLANK, max_symbols=MAX_SYMBOLS_PER_STEP):
  B, T, H = f.shape
  active = time_idx < f_lens
  emit = active & (symbols != blank_id) & (symbols_added < max_symbols)
  advance = active & (~emit)
  new_sa = jnp.where(emit, symbols_added + 1,
                     jnp.where(advance, 0, symbols_added))
  new_ridx = jnp.where(emit, res_idx + 1, res_idx)
  new_tidx = jnp.where(advance, time_idx + 1, time_idx)
  new_preg = jnp.where(emit, symbols, pre_g)
  pos = jnp.arange(res.shape[-1])[None, :]
  new_res = jnp.where(emit[:, None] & (pos == res_idx[:, None]),
                      symbols[:, None], res)
  take = advance & (new_tidx < f_lens)
  frame = f[jnp.arange(B), jnp.clip(new_tidx, 0, T - 1)]
  new_fi = jnp.where(take[:, None], frame, fi)
  new_pre_hg = [jnp.where(emit[:, None], h, p) for h, p in zip(hg, pre_hg)]
  new_pre_cg = [jnp.where(emit[:, None], c, p) for c, p in zip(cg, pre_cg)]
  done = jnp.all(new_tidx >= f_lens)
  return done, dict(symbols_added=new_sa, res=new_res, res_idx=new_ridx,
                    time_idx=new_tidx, fi=new_fi, pre_g=new_preg,
                    pre_hg=new_pre_hg, pre_cg=new_pre_cg)


if __name__ == "__main__":
  import numpy as np

  B, T, H, L, MAX_LEN = 3, 8, 128, 2, 64
  key = jax.random.PRNGKey(0)
  keys = jax.random.split(key, 2 + 4 * L)

  f = jax.random.normal(keys[0], (B, T, H), jnp.float32)
  fi = jax.random.normal(keys[1], (B, H), jnp.float32)
  pre_hg = [jax.random.normal(keys[2 + l], (B, H), jnp.float32) for l in range(L)]
  pre_cg = [jax.random.normal(keys[2 + L + l], (B, H), jnp.float32) for l in range(L)]
  hg = [jax.random.normal(keys[2 + 2 * L + l], (B, H), jnp.float32) for l in range(L)]
  cg = [jax.random.normal(keys[2 + 3 * L + l], (B, H), jnp.float32) for l in range(L)]

  # batch elem 0: emits a symbol; elem 1: blank -> advances time & refreshes fi;
  # elem 2: already finished (time_idx >= f_lens) -> untouched.
  symbols = jnp.array([7, RNNT_BLANK, 3], jnp.int32)
  symbols_added = jnp.array([1, 2, 0], jnp.int32)
  res = jnp.zeros((B, MAX_LEN), jnp.int32)
  res_idx = jnp.array([2, 1, 0], jnp.int32)
  f_lens = jnp.array([8, 6, 4], jnp.int32)
  time_idx = jnp.array([3, 2, 4], jnp.int32)
  pre_g = jnp.full((B,), RNNT_BLANK, jnp.int32)

  args = (symbols, symbols_added, res, res_idx, f, f_lens, time_idx, fi,
          pre_g, pre_hg, pre_cg, hg, cg)

  done, upd = greedy_decode_update(*args)
  jax.block_until_ready(upd["fi"])

  done_ref, upd_ref = reference_update(*args)

  np.testing.assert_array_equal(np.asarray(done), np.asarray(done_ref))
  for k in ("symbols_added", "res", "res_idx", "time_idx", "pre_g"):
    np.testing.assert_array_equal(np.asarray(upd[k]), np.asarray(upd_ref[k]))
  np.testing.assert_allclose(np.asarray(upd["fi"]), np.asarray(upd_ref["fi"]),
                             atol=1e-6, rtol=0)
  for l in range(L):
    np.testing.assert_allclose(np.asarray(upd["pre_hg"][l]),
                               np.asarray(upd_ref["pre_hg"][l]), atol=1e-6, rtol=0)
    np.testing.assert_allclose(np.asarray(upd["pre_cg"][l]),
                               np.asarray(upd_ref["pre_cg"][l]), atol=1e-6, rtol=0)

  print("KERNEL_OK")
</pallas_src>

<mosaic_0001>
module attributes {stable_mosaic.version = 11 : i64} {
  func.func @_update_kernel(%arg0: memref<3xi32, #tpu.memory_space<smem>>, %arg1: memref<3x1xi32, #tpu.memory_space<vmem>>, %arg2: memref<3x1xi32, #tpu.memory_space<vmem>>, %arg3: memref<3x1xi32, #tpu.memory_space<vmem>>, %arg4: memref<3x1xi32, #tpu.memory_space<vmem>>, %arg5: memref<3x1xi32, #tpu.memory_space<vmem>>, %arg6: memref<3x1xi32, #tpu.memory_space<vmem>>, %arg7: memref<3x128xi32, #tpu.memory_space<vmem>>, %arg8: memref<3x128xf32, #tpu.memory_space<vmem>>, %arg9: memref<3x256xf32, #tpu.memory_space<vmem>>, %arg10: memref<3x256xf32, #tpu.memory_space<vmem>>, %arg11: memref<3x256xf32, #tpu.memory_space<vmem>>, %arg12: memref<3x256xf32, #tpu.memory_space<vmem>>, %arg13: memref<3x8x128xf32, #tpu.memory_space<any>>, %arg14: memref<3x1xi32, #tpu.memory_space<vmem>>, %arg15: memref<3x1xi32, #tpu.memory_space<vmem>>, %arg16: memref<3x1xi32, #tpu.memory_space<vmem>>, %arg17: memref<3x1xi32, #tpu.memory_space<vmem>>, %arg18: memref<3x128xi32, #tpu.memory_space<vmem>>, %arg19: memref<3x128xf32, #tpu.memory_space<vmem>>, %arg20: memref<3x256xf32, #tpu.memory_space<vmem>>, %arg21: memref<3x256xf32, #tpu.memory_space<vmem>>, %arg22: memref<3x128xf32, #tpu.memory_space<vmem>>, %arg23: memref<!tpu.dma_semaphore, #tpu.memory_space<semaphore_mem>>) attributes {dimension_semantics = [], scalar_prefetch = 0 : i64, scratch_operands = 2 : i64, tpu.core_type = #tpu.core_type<tc>} {
    %c0_i32 = arith.constant 0 : i32
    %c3_i32 = arith.constant 3 : i32
    %0 = arith.addi %c0_i32, %c3_i32 : i32
    %c1_i32 = arith.constant 1 : i32
    scf.for %arg24 = %c0_i32 to %0 step %c1_i32  : i32 {
      %c1_i32_50 = arith.constant 1 : i32
      %63 = arith.muli %arg24, %c1_i32_50 : i32
      %c0_i32_51 = arith.constant 0 : i32
      %64 = arith.addi %c0_i32_51, %63 : i32
      %65 = arith.index_cast %64 : i32 to index
      %66 = memref.load %arg0[%65] : memref<3xi32, #tpu.memory_space<smem>>
      %c1_i32_52 = arith.constant 1 : i32
      %67 = arith.addi %66, %c1_i32_52 : i32
      %c7_i32 = arith.constant 7 : i32
      %68 = arith.minsi %67, %c7_i32 : i32
      %c0_i32_53 = arith.constant 0 : i32
      %69 = tpu.memref_slice %arg13[%64, %68, %c0_i32_53] : memref<3x8x128xf32, #tpu.memory_space<any>> -> memref<1x1x128xf32, #tpu.memory_space<any>>
      %70 = tpu.memref_squeeze %69 : memref<1x1x128xf32, #tpu.memory_space<any>> -> memref<128xf32, #tpu.memory_space<any>>
      %c0_i32_54 = arith.constant 0 : i32
      %71 = tpu.memref_slice %arg22[%64, %c0_i32_54] : memref<3x128xf32, #tpu.memory_space<vmem>> -> memref<1x128xf32, #tpu.memory_space<vmem>>
      %72 = tpu.memref_squeeze %71 : memref<1x128xf32, #tpu.memory_space<vmem>> -> memref<128xf32, #tpu.memory_space<vmem>>
      tpu.enqueue_dma source(%70 : memref<128xf32, #tpu.memory_space<any>>) target(%72 : memref<128xf32, #tpu.memory_space<vmem>>) target_semaphore(%arg23 : memref<!tpu.dma_semaphore, #tpu.memory_space<semaphore_mem>>)
    }
    %c3_i32_0 = arith.constant 3 : i32
    %c0 = arith.constant 0 : index
    %c0_1 = arith.constant 0 : index
    %1 = vector.load %arg1[%c0, %c0_1] : memref<3x1xi32, #tpu.memory_space<vmem>>, vector<3x1xi32>
    %c0_2 = arith.constant 0 : index
    %c0_3 = arith.constant 0 : index
    %2 = vector.load %arg2[%c0_2, %c0_3] : memref<3x1xi32, #tpu.memory_space<vmem>>, vector<3x1xi32>
    %c0_4 = arith.constant 0 : index
    %c0_5 = arith.constant 0 : index
    %3 = vector.load %arg3[%c0_4, %c0_5] : memref<3x1xi32, #tpu.memory_space<vmem>>, vector<3x1xi32>
    %c0_6 = arith.constant 0 : index
    %c0_7 = arith.constant 0 : index
    %4 = vector.load %arg4[%c0_6, %c0_7] : memref<3x1xi32, #tpu.memory_space<vmem>>, vector<3x1xi32>
    %c0_8 = arith.constant 0 : index
    %c0_9 = arith.constant 0 : index
    %5 = vector.load %arg5[%c0_8, %c0_9] : memref<3x1xi32, #tpu.memory_space<vmem>>, vector<3x1xi32>
    %c0_10 = arith.constant 0 : index
    %c0_11 = arith.constant 0 : index
    %6 = vector.load %arg6[%c0_10, %c0_11] : memref<3x1xi32, #tpu.memory_space<vmem>>, vector<3x1xi32>
    %7 = arith.cmpi slt, %4, %5 : vector<3x1xi32>
    %c28_i32 = arith.constant 28 : i32
    %8 = vector.broadcast %c28_i32 : i32 to vector<3x1xi32>
    %9 = arith.cmpi ne, %1, %8 : vector<3x1xi32>
    %10 = arith.andi %7, %9 : vector<3x1xi1>
    %c30_i32 = arith.constant 30 : i32
    %11 = vector.broadcast %c30_i32 : i32 to vector<3x1xi32>
    %12 = arith.cmpi slt, %2, %11 : vector<3x1xi32>
    %13 = arith.andi %10, %12 : vector<3x1xi1>
    %cst = arith.constant dense<true> : vector<3x1xi1>
    %14 = arith.xori %13, %cst : vector<3x1xi1>
    %15 = arith.andi %7, %14 : vector<3x1xi1>
    %c1_i32_12 = arith.constant 1 : i32
    %16 = vector.broadcast %c1_i32_12 : i32 to vector<3x1xi32>
    %17 = arith.addi %4, %16 : vector<3x1xi32>
    %18 = arith.select %15, %17, %4 : vector<3x1xi1>, vector<3x1xi32>
    %c1_i32_13 = arith.constant 1 : i32
    %19 = vector.broadcast %c1_i32_13 : i32 to vector<3x1xi32>
    %20 = arith.addi %2, %19 : vector<3x1xi32>
    %c0_i32_14 = arith.constant 0 : i32
    %21 = vector.broadcast %c0_i32_14 : i32 to vector<3x1xi32>
    %22 = arith.select %15, %21, %2 : vector<3x1xi1>, vector<3x1xi32>
    %23 = arith.select %13, %20, %22 : vector<3x1xi1>, vector<3x1xi32>
    %c0_15 = arith.constant 0 : index
    %c0_16 = arith.constant 0 : index
    %24 = vector.load %arg14[%c0_15, %c0_16] : memref<3x1xi32, #tpu.memory_space<vmem>>, vector<3x1xi32>
    tpu.vector_store %arg14[%c0_15, %c0_16], %23 {strides = array<i32>} : memref<3x1xi32, #tpu.memory_space<vmem>>, vector<3x1xi32>,
    %c1_i32_17 = arith.constant 1 : i32
    %25 = vector.broadcast %c1_i32_17 : i32 to vector<3x1xi32>
    %26 = arith.addi %3, %25 : vector<3x1xi32>
    %27 = arith.select %13, %26, %3 : vector<3x1xi1>, vector<3x1xi32>
    %c0_18 = arith.constant 0 : index
    %c0_19 = arith.constant 0 : index
    %28 = vector.load %arg15[%c0_18, %c0_19] : memref<3x1xi32, #tpu.memory_space<vmem>>, vector<3x1xi32>
    tpu.vector_store %arg15[%c0_18, %c0_19], %27 {strides = array<i32>} : memref<3x1xi32, #tpu.memory_space<vmem>>, vector<3x1xi32>,
    %c0_20 = arith.constant 0 : index
    %c0_21 = arith.constant 0 : index
    %29 = vector.load %arg16[%c0_20, %c0_21] : memref<3x1xi32, #tpu.memory_space<vmem>>, vector<3x1xi32>
    tpu.vector_store %arg16[%c0_20, %c0_21], %18 {strides = array<i32>} : memref<3x1xi32, #tpu.memory_space<vmem>>, vector<3x1xi32>,
    %30 = arith.select %13, %1, %6 : vector<3x1xi1>, vector<3x1xi32>
    %c0_22 = arith.constant 0 : index
    %c0_23 = arith.constant 0 : index
    %31 = vector.load %arg17[%c0_22, %c0_23] : memref<3x1xi32, #tpu.memory_space<vmem>>, vector<3x1xi32>
    tpu.vector_store %arg17[%c0_22, %c0_23], %30 {strides = array<i32>} : memref<3x1xi32, #tpu.memory_space<vmem>>, vector<3x1xi32>,
    %32 = tpu.iota {dimensions = array<i32: 1>} : vector<3x128xi32>
    %33 = vector.broadcast %3 : vector<3x1xi32> to vector<3x128xi32>
    %34 = arith.cmpi eq, %32, %33 : vector<3x128xi32>
    %35 = vector.broadcast %13 : vector<3x1xi1> to vector<3x128xi1>
    %36 = arith.andi %35, %34 : vector<3x128xi1>
    %c0_24 = arith.constant 0 : index
    %c0_25 = arith.constant 0 : index
    %37 = vector.load %arg7[%c0_24, %c0_25] : memref<3x128xi32, #tpu.memory_space<vmem>>, vector<3x128xi32>
    %38 = vector.shape_cast %1 : vector<3x1xi32> to vector<3x1xi32>
    %39 = vector.broadcast %38 : vector<3x1xi32> to vector<3x128xi32>
    %40 = arith.select %36, %39, %37 : vector<3x128xi1>, vector<3x128xi32>
    %c0_26 = arith.constant 0 : index
    %c0_27 = arith.constant 0 : index
    %41 = vector.load %arg18[%c0_26, %c0_27] : memref<3x128xi32, #tpu.memory_space<vmem>>, vector<3x128xi32>
    tpu.vector_store %arg18[%c0_26, %c0_27], %40 {strides = array<i32>} : memref<3x128xi32, #tpu.memory_space<vmem>>, vector<3x128xi32>,
    %c0_28 = arith.constant 0 : index
    %c0_29 = arith.constant 0 : index
    %42 = vector.load %arg11[%c0_28, %c0_29] : memref<3x256xf32, #tpu.memory_space<vmem>>, vector<3x256xf32>
    %c0_30 = arith.constant 0 : index
    %c0_31 = arith.constant 0 : index
    %43 = vector.load %arg9[%c0_30, %c0_31] : memref<3x256xf32, #tpu.memory_space<vmem>>, vector<3x256xf32>
    %44 = vector.shape_cast %13 : vector<3x1xi1> to vector<3x1xi1>
    %45 = vector.broadcast %44 : vector<3x1xi1> to vector<3x256xi1>
    %46 = arith.select %45, %42, %43 : vector<3x256xi1>, vector<3x256xf32>
    %c0_32 = arith.constant 0 : index
    %c0_33 = arith.constant 0 : index
    %47 = vector.load %arg20[%c0_32, %c0_33] : memref<3x256xf32, #tpu.memory_space<vmem>>, vector<3x256xf32>
    tpu.vector_store %arg20[%c0_32, %c0_33], %46 {strides = array<i32>} : memref<3x256xf32, #tpu.memory_space<vmem>>, vector<3x256xf32>,
    %c0_34 = arith.constant 0 : index
    %c0_35 = arith.constant 0 : index
    %48 = vector.load %arg12[%c0_34, %c0_35] : memref<3x256xf32, #tpu.memory_space<vmem>>, vector<3x256xf32>
    %c0_36 = arith.constant 0 : index
    %c0_37 = arith.constant 0 : index
    %49 = vector.load %arg10[%c0_36, %c0_37] : memref<3x256xf32, #tpu.memory_space<vmem>>, vector<3x256xf32>
    %50 = vector.shape_cast %13 : vector<3x1xi1> to vector<3x1xi1>
    %51 = vector.broadcast %50 : vector<3x1xi1> to vector<3x256xi1>
    %52 = arith.select %51, %48, %49 : vector<3x256xi1>, vector<3x256xf32>
    %c0_38 = arith.constant 0 : index
    %c0_39 = arith.constant 0 : index
    %53 = vector.load %arg21[%c0_38, %c0_39] : memref<3x256xf32, #tpu.memory_space<vmem>>, vector<3x256xf32>
    tpu.vector_store %arg21[%c0_38, %c0_39], %52 {strides = array<i32>} : memref<3x256xf32, #tpu.memory_space<vmem>>, vector<3x256xf32>,
    %c0_i32_40 = arith.constant 0 : i32
    %c3_i32_41 = arith.constant 3 : i32
    %54 = arith.addi %c0_i32_40, %c3_i32_41 : i32
    %c1_i32_42 = arith.constant 1 : i32
    scf.for %arg24 = %c0_i32_40 to %54 step %c1_i32_42  : i32 {
      %c1_i32_50 = arith.constant 1 : i32
      %63 = arith.muli %arg24, %c1_i32_50 : i32
      %c0_i32_51 = arith.constant 0 : i32
      %64 = arith.addi %c0_i32_51, %63 : i32
      %65 = arith.index_cast %64 : i32 to index
      %66 = memref.load %arg0[%65] : memref<3xi32, #tpu.memory_space<smem>>
      %c1_i32_52 = arith.constant 1 : i32
      %67 = arith.addi %66, %c1_i32_52 : i32
      %c7_i32 = arith.constant 7 : i32
      %68 = arith.minsi %67, %c7_i32 : i32
      %c0_i32_53 = arith.constant 0 : i32
      %69 = tpu.memref_slice %arg13[%64, %68, %c0_i32_53] : memref<3x8x128xf32, #tpu.memory_space<any>> -> memref<1x1x128xf32, #tpu.memory_space<any>>
      %70 = tpu.memref_squeeze %69 : memref<1x1x128xf32, #tpu.memory_space<any>> -> memref<128xf32, #tpu.memory_space<any>>
      %c0_i32_54 = arith.constant 0 : i32
      %71 = tpu.memref_slice %arg22[%64, %c0_i32_54] : memref<3x128xf32, #tpu.memory_space<vmem>> -> memref<1x128xf32, #tpu.memory_space<vmem>>
      %72 = tpu.memref_squeeze %71 : memref<1x128xf32, #tpu.memory_space<vmem>> -> memref<128xf32, #tpu.memory_space<vmem>>
      tpu.wait_dma2 semaphore(%arg23 : memref<!tpu.dma_semaphore, #tpu.memory_space<semaphore_mem>>) src(%70 : memref<128xf32, #tpu.memory_space<any>>) dst(%72 : memref<128xf32, #tpu.memory_space<vmem>>)
    }
    %c3_i32_43 = arith.constant 3 : i32
    %55 = arith.cmpi slt, %18, %5 : vector<3x1xi32>
    %56 = arith.andi %15, %55 : vector<3x1xi1>
    %c0_44 = arith.constant 0 : index
    %c0_45 = arith.constant 0 : index
    %57 = vector.load %arg22[%c0_44, %c0_45] : memref<3x128xf32, #tpu.memory_space<vmem>>, vector<3x128xf32>
    %c0_46 = arith.constant 0 : index
    %c0_47 = arith.constant 0 : index
    %58 = vector.load %arg8[%c0_46, %c0_47] : memref<3x128xf32, #tpu.memory_space<vmem>>, vector<3x128xf32>
    %59 = vector.shape_cast %56 : vector<3x1xi1> to vector<3x1xi1>
    %60 = vector.broadcast %59 : vector<3x1xi1> to vector<3x128xi1>
    %61 = arith.select %60, %57, %58 : vector<3x128xi1>, vector<3x128xf32>
    %c0_48 = arith.constant 0 : index
    %c0_49 = arith.constant 0 : index
    %62 = vector.load %arg19[%c0_48, %c0_49] : memref<3x128xf32, #tpu.memory_space<vmem>>, vector<3x128xf32>
    tpu.vector_store %arg19[%c0_48, %c0_49], %61 {strides = array<i32>} : memref<3x128xf32, #tpu.memory_space<vmem>>, vector<3x128xf32>,
    return
  }
}

</mosaic_0001>

<bundles_post_ra>
// kernel: tpu_custom_call.1
= control target key start
LH: loop header
LB: loop body
LE: loop exit
PB: predicated region body
PF: predicated region fallthrough
CT: control target
= control target key end

     0   :  { %s547_s0 = inlined_call_operand.vmem [shape: s32[3], index: 0, kind: input, shape index: {}]   ;;  %s548_s1 = inlined_call_operand.vmem [shape: s32[3,1], index: 1, kind: input, shape index: {}]   ;;  %s549_s2 = inlined_call_operand.vmem [shape: s32[3,1], index: 2, kind: input, shape index: {}, may-alias: {2,14}]   ;;  %s550_s3 = inlined_call_operand.vmem [shape: s32[3,1], index: 3, kind: input, shape index: {}, may-alias: {3,15}]   ;;  %s551_s4 = inlined_call_operand.vmem [shape: s32[3,1], index: 4, kind: input, shape index: {}, may-alias: {4,16}]   ;;  %s552_s5 = inlined_call_operand.vmem [shape: s32[3,1], index: 5, kind: input, shape index: {}]   ;;  %s553_s6 = inlined_call_operand.vmem [shape: s32[3,1], index: 6, kind: input, shape index: {}, may-alias: {6,17}]   ;;  %s554_s7 = inlined_call_operand.vmem [shape: s32[3,128], index: 7, kind: input, shape index: {}, may-alias: {7,18}]   ;;  %s555_s8 = inlined_call_operand.vmem [shape: f32[3,128], index: 8, kind: input, shape index: {}, may-alias: {8,19}]   ;;  %s556_s9 = inlined_call_operand.vmem [shape: f32[3,256], index: 9, kind: input, shape index: {}, may-alias: {9,20}]   ;;  %s557_s10 = inlined_call_operand.vmem [shape: f32[3,256], index: 10, kind: input, shape index: {}, may-alias: {10,21}]   ;;  %s558_s11 = inlined_call_operand.vmem [shape: f32[3,256], index: 11, kind: input, shape index: {}]   ;;  %s559_s12 = inlined_call_operand.vmem [shape: f32[3,256], index: 12, kind: input, shape index: {}]   ;;  %s560_s13 = inlined_call_operand.vmem [shape: f32[3,8,128], index: 13, kind: input, shape index: {}]   ;;  %s561_s14 = inlined_call_operand.vmem [shape: s32[3,1], index: 14, kind: output, shape index: {0}, may-alias: {2,14}]   ;;  %s562_s15 = inlined_call_operand.vmem [shape: s32[3,1], index: 15, kind: output, shape index: {1}, may-alias: {3,15}]   ;;  %s563_s16 = inlined_call_operand.vmem [shape: s32[3,1], index: 16, kind: output, shape index: {2}, may-alias: {4,16}]   ;;  %s564_s17 = inlined_call_operand.vmem [shape: s32[3,1], index: 17, kind: output, shape index: {3}, may-alias: {6,17}]   ;;  %s565_s18 = inlined_call_operand.vmem [shape: s32[3,128], index: 18, kind: output, shape index: {4}, may-alias: {7,18}]   ;;  %s566_s19 = inlined_call_operand.vmem [shape: f32[3,128], index: 19, kind: output, shape index: {5}, may-alias: {8,19}]   ;;  %s567_s20 = inlined_call_operand.vmem [shape: f32[3,256], index: 20, kind: output, shape index: {6}, may-alias: {9,20}]   ;;  %s568_s21 = inlined_call_operand.vmem [shape: f32[3,256], index: 21, kind: output, shape index: {7}, may-alias: {10,21}]  }
   0x1   :  { %569 = sst [smem:[#allocation9_spill]] %s547_s0 }
   0x2   :  { %570 = sst [smem:[#allocation10_spill]] %s548_s1 }
   0x3   :  { %571 = sst [smem:[#allocation11_spill]] %s549_s2 }
   0x4   :  { %572 = sst [smem:[#allocation12_spill]] %s550_s3 }
   0x5   :  { %573 = sst [smem:[#allocation13_spill]] %s551_s4 }
   0x6   :  { %574 = sst [smem:[#allocation14_spill]] %s552_s5 }
   0x7   :  { %27 = vsyncpa [#allocation5], 0  ;;  %s575_s26 = sld [smem:[#allocation9_spill]] }
   0xd   :  { %s34_s27 = sshll.u32 %s575_s26, 4  ;;  %s35_s27 = int_to_ptr.vmem [resolvable:$true] %s34_s27 }
   0xe   :  { %s309_s3 = scalar_lea.vmem %s35_s27, 16  ;;  %p314_p1 = scmp.lt.s32.totalorder %s35_s27, %s35_s27 }
   0xf   :  { %p310_p0 = scmp.ne.s32.totalorder %s35_s27, %s309_s3  ;;  %p315_p2 = scmp.lt.s32.totalorder %s309_s3, %s309_s3 }
  0x11   :  { %p316_p3 = por %p315_p2, %p314_p1 }
  0x13   :  { %p317_p4 = pnand %p316_p3, %p310_p0 }
  0x15   :  { %320 = shalt.err (!%p317_p4)
}
  0x16   :  { %s341_s28 = smov [#allocation4]  }
  0x17   :  { %37 = dma.vmem_to_smem %s35_s27, 16, %s341_s28, [#allocation5]  }
  0x18   :  { %329 = dma.done.wait [#allocation5], 16  }
  0x19   :  { %330 = vsyncadd [#allocation5], 4294967280 }
  0x1a   :  { %65 = sfence }
  0x1b   :  { %s333_s29 = smov 0  }
  0x1c LB: > { %s72_s0 = sld [smem:[#allocation4 + %s335_s29]]  ;;  %s281_s30 = sshll.u32 %s335_s29, 3  ;;  %s335_s29 = sphi %s333_s29, %s71_s29  }
  0x1d   : > { %s79_s24 = scalar_lea.vmem [#allocation2], %s335_s29 }
  0x22   : > { %s73_s4 = sadd.s32 1, %s72_s0 }
  0x23   : > { %p74_p5 = scmp.lt.s32.totalorder %s73_s4, 7 }
  0x25   : > { %s584_s4 = smov (!%p74_p5, %s73_s4), 7 }
  0x26   : > { %s77_s5 = sadd.s32 %s281_s30, %s584_s4 }
  0x27   : > { %s78_s1 = scalar_lea.vmem %s560_s13, %s77_s5 }
  0x28   : > { %v97_v0 = vld [vmem:[%s78_s1] sm:$0x1] }
  0x29   : > { %98 = vst [vmem:[%s79_s24] sm:$0x1] %v97_v0 }
  0x2a   : > { %123 = vsyncadd [#allocation3], 16  ;;  %s71_s29 = sadd.s32 1, %s335_s29  }
  0x2b   : > { %p68_p6 = scmp.ge.s32.totalorder %s71_s29, 3  }
  0x2c   :  { %s576_s26 = sld [smem:[#allocation10_spill]] (%p68_p6)  ;;  %s577_s28 = sld [smem:[#allocation11_spill]] (%p68_p6)  ;;  %v342_v3 = vmov (%p68_p6), 0   ;;  %v129_v6 = vld [vmem:[%s553_s6] sm:$0x7] (%p68_p6)  ;;  %vm142_vm4 = vcmask (%p68_p6), 2048   ;;  %v150_v22 = vlaneseq (%p68_p6) }
  0x2d   :  { %70 = sbr.rel (!%p68_p6) target bundleno = 28 (0x1c), region = 188  ;;  %302 = vset.pattern.permute.xlu0 (%p68_p6), %v342_v3  ;;  %s578_s30 = sld [smem:[#allocation13_spill]] (%p68_p6)  ;;  %303 = vset.pattern.permute.xlu1 (%p68_p6), %v342_v3  ;;  %vm343_vm6 = vmmov (%p68_p6), 1   ;;  %v168_v18 = vld [vmem:[%s558_s11] sm:$0x77] (%p68_p6) }
  0x2e   :  { %s579_s23 = sld [smem:[#allocation14_spill]] (%p68_p6)  ;;  %s580_s2 = sld [smem:[#allocation12_spill]] (%p68_p6)  ;;  %v169_v19 = vld [vmem:[%s556_s9] sm:$0x77] (%p68_p6)  ;;  %v171_v23 = vcombine.high (%p68_p6), %v168_v18, %v168_v18  ;;  %v151_v28 = vand.u32 (%p68_p6), 127, %v150_v22 }
  0x2f   :  { %v183_v20 = vld [vmem:[%s559_s12] sm:$0x77] (%p68_p6)  ;;  %v174_v24 = vcombine.high (%p68_p6), %v169_v19, %v169_v19 }
  0x30   :  { %v184_v21 = vld [vmem:[%s557_s10] sm:$0x77] (%p68_p6)  ;;  %v186_v25 = vcombine.high (%p68_p6), %v183_v20, %v183_v20 }
  0x31   :  { %v189_v26 = vcombine.high (%p68_p6), %v184_v21, %v184_v21  ;;  %v162_v36 = vld [vmem:[%s554_s7] sm:$0x7] (%p68_p6) }
  0x32   :  { %v124_v1 = vld [vmem:[%s576_s26] sm:$0x7] (%p68_p6) }
  0x33   :  { %v125_v2 = vld [vmem:[%s577_s28] sm:$0x7] (%p68_p6)  ;;  %vm131_vm1 = vcmp.ne.s32.totalorder (%p68_p6), %v124_v1, 28  ;;  %164 = vperm.xlu1 (%p68_p6), %303, %v124_v1  }
  0x34   :  { %v127_v4 = vld [vmem:[%s578_s30] sm:$0x7]  ;;  %vm133_vm2 = vcmp.lt.s32.totalorder %v125_v2, 30  ;;  %v139_v10 = vadd.s32 1, %v125_v2 }
  0x35   :  { %v473_v5 = vld [vmem:[%s579_s23] sm:$0x7]  ;;  %v137_v8 = vadd.s32 1, %v127_v4 }
  0x36   :  { %vm130_vm0 = vcmp.lt.s32.totalorder %v127_v4, %v473_v5  ;;  %v126_v7 = vld [vmem:[%s580_s2] sm:$0x7]  ;;  %s337_s2 = smov 0  }
  0x37   :  { %vm132_vm3 = vmand %vm130_vm0, %vm131_vm1  ;;  %v144_v9 = vadd.s32 1, %v126_v7 }
  0x38   :  { %vm134_vm5 = vmand %vm132_vm3, %vm133_vm2 }
  0x39   :  { %v156_v11 = vsel %vm134_vm5, 1, %v342_v3  ;;  %vm135_vm7 = vmxor %vm134_vm5, %vm343_vm6  ;;  %v148_v12 = vsel %vm134_vm5, %v124_v1, %v129_v6  ;;  %v145_v13 = vsel %vm134_vm5, %v144_v9, %v126_v7 }
  0x3a   :  { %158 = vperm.xlu0 %302, %v156_v11   ;;  %vm488_vm8 = vmand %vm130_vm0, %vm135_vm7  ;;  %146 = vst.msk [vmem:[%s562_s15] sm:$0x7] %vm142_vm4, %v145_v13 }
  0x3b   :  { %149 = vst.msk [vmem:[%s564_s17] sm:$0x7] %vm142_vm4, %v148_v12  ;;  %v138_v15 = vsel %vm488_vm8, %v137_v8, %v127_v4  ;;  %v140_v16 = vsel %vm488_vm8, 0, %v125_v2 }
  0x3c   :  { %v141_v17 = vsel %vm134_vm5, %v139_v10, %v140_v16  ;;  %147 = vst.msk [vmem:[%s563_s16] sm:$0x7] %vm142_vm4, %v138_v15 }
  0x3d   :  { %143 = vst.msk [vmem:[%s561_s14] sm:$0x7] %vm142_vm4, %v141_v17 }
  0x3e   :  { %153 = vperm.xlu0 %302, %v126_v7  }
  0xb2   :  { %v165_v37 = vpop.permute.xlu1 %164 }
  0xb9   :  { %v159_v27 = vpop.permute.xlu0 %158 }
  0xba   :  { %vm160_vm9 = vcmp.eq.s32.totalorder %v159_v27, 1 }
  0xbb   :  { %v176_v29 = vsel %vm160_vm9, %v168_v18, %v169_v19  ;;  %v177_v30 = vsel %vm160_vm9, %v171_v23, %v174_v24  ;;  %v191_v31 = vsel %vm160_vm9, %v183_v20, %v184_v21  ;;  %v192_v32 = vsel %vm160_vm9, %v186_v25, %v189_v26 }
  0xbc   :  { %v180_v33 = vcombine.low %v176_v29, %v177_v30  ;;  %v195_v34 = vcombine.low %v191_v31, %v192_v32 }
  0xbd   :  { %v154_v35 = vpop.permute.xlu0 %153 }
  0xbe   :  { %182 = vst [vmem:[%s567_s20] sm:$0x77] %v180_v33  ;;  %197 = vst [vmem:[%s568_s21] sm:$0x77] %v195_v34  ;;  %vm155_vm10 = vcmp.eq.s32.totalorder %v151_v28, %v154_v35 }
  0xbf   :  { %vm161_vm11 = vmand %vm160_vm9, %vm155_vm10 }
  0xc0   :  { %v166_v38 = vsel %vm161_vm11, %v165_v37, %v162_v36 }
  0xc1   :  { %167 = vst [vmem:[%s565_s18] sm:$0x7] %v166_v38 }
  0xc2 LB: > { %331 = dma.done.wait [#allocation3], 16  ;;  %s339_s2 = sphi %s337_s2, %s203_s2  }
  0xc3   : > { %332 = vsyncadd [#allocation3], 4294967280  ;;  %s203_s2 = sadd.s32 1, %s339_s2  }
  0xc4   : > { %p200_p7 = scmp.ge.s32.totalorder %s203_s2, 3  }
  0xc5   :  { %308 = vset.pattern.permute.xlu0 (%p200_p7), %v342_v3  ;;  %vm207_vm12 = vcmp.lt.s32.totalorder (%p200_p7), %v138_v15, %v473_v5  ;;  %v209_v40 = vld [vmem:[#allocation2] sm:$0x7] (%p200_p7) }
  0xc6   :  { %202 = sbr.rel (!%p200_p7) target bundleno = 194 (0xc2), region = 199  ;;  %vm208_vm13 = vmand (%p200_p7), %vm488_vm8, %vm207_vm12  ;;  %v210_v41 = vld [vmem:[%s555_s8] sm:$0x7] (%p200_p7) }
  0xc7   :  { %v211_v39 = vsel (%p200_p7), %vm208_vm13, 1, %v342_v3 }
  0xc8   :  { %213 = vperm.xlu0 (%p200_p7), %308, %v211_v39  }
 0x147   :  { %v214_v42 = vpop.permute.xlu0 %213 }
 0x148   :  { %vm215_vm14 = vcmp.eq.s32.totalorder %v214_v42, 1 }
 0x149   :  { %v216_v43 = vsel %vm215_vm14, %v209_v40, %v210_v41 }
 0x14a   :  { %217 = vst [vmem:[%s566_s19] sm:$0x7] %v216_v43 }
 0x14b   :  { %250 = vsyncpa [#allocation5], 1 }
 0x14c   :  { %251 = vsyncmov [#allocation3] }
 0x14f   :  { %s252_s6 = vpop.sfrf %251 }
 0x150   :  { %p282_p8 = scmp.ne.s32.totalorder %s252_s6, 0 }
 0x152   :  { %256 = shalt.err (%p282_p8)  }

</bundles_post_ra>
